<compile_context>
chip_gen: v7x
topology: tpu7x:2x2x1
jax: 0.10.0
libtpu: 0.0.40
codegen_flags: <defaults>
</compile_context>

<pallas_src>
import jax
import jax.numpy as jnp
from jax.experimental import pallas as pl
from jax.experimental.pallas import tpu as pltpu

_MAX_BATCH_TILE = 8  # cap static per-b unroll inside the kernel


def _make_conv_bn_relu_kernel(bn_tile):
    def kernel(x_ref, w_ref, shift_ref, o_ref):
        # x_ref:     (Bn, Cin, THW)   batch tile x spatial tile
        # w_ref:     (Cout, Cin)      BN-scale-folded 1x1 conv weight
        # shift_ref: (Cout, 1)        folded BN shift (f32)
        # o_ref:     (Bn, Cout, THW)
        w = w_ref[...]
        shift = shift_ref[...]
        # Static loop over the (small) batch tile: one clean (Cout,Cin)@(Cin,THW)
        # MXU matmul per image -- avoids the transpose a batched einsum would
        # need to put the batch axis back in front of the channel axis.
        for b in range(bn_tile):
            acc = jnp.dot(w, x_ref[b], preferred_element_type=jnp.float32)
            o_ref[b] = jnp.maximum(acc + shift, 0.0).astype(o_ref.dtype)
    return kernel


def _vmem_capacity_bytes():
    try:
        info = pltpu.get_tpu_info()
        return int(getattr(info, "vmem_capacity_bytes", 64 << 20))
    except Exception:
        return 64 << 20  # conservative: v7x per-TensorCore VMEM


def _select_tiling(N, Cin, Cout, HW, x_itemsize, out_itemsize):
    vmem_cap = _vmem_capacity_bytes()
    # Budget for the double-buffered x/out blocks (leave headroom for the
    # resident W/shift copies and compiler scratch).
    block_budget = max(8 << 20, int(vmem_cap * 0.45))

    bytes_per_lane = Cin * x_itemsize + Cout * out_itemsize  # per spatial elem, per image

    # Target ~2 MiB per x-block read (>=512-lane tiles reach ~85% of the HBM
    # roofline; bigger amortizes the per-step overhead further), capped so the
    # double-buffered in+out blocks fit the VMEM budget.
    tile_hw = (2 << 20) // max(1, Cin * x_itemsize)
    tile_hw = min(tile_hw, block_budget // (2 * bytes_per_lane))
    tile_hw = max(128, (tile_hw // 128) * 128)

    if tile_hw >= HW:
        tile_hw = HW
        # v7x megacore: if a single image would collapse to one grid step,
        # split the spatial axis so both TensorCores get work.
        if N == 1 and HW >= 256:
            tile_hw = max(128, (pl.cdiv(HW, 2) // 128) * 128)
    hw_tiles = pl.cdiv(HW, tile_hw)

    # Batch tile: raise per-step DMA bytes toward ~1 MiB when HW/Cin are small.
    per_step_x = Cin * tile_hw * x_itemsize
    bn = max(1, min(N, (1 << 20) // max(1, per_step_x)))
    bn = min(bn, _MAX_BATCH_TILE,
             max(1, block_budget // (2 * bytes_per_lane * tile_hw)))
    if hw_tiles == 1 and N > 1:
        bn = min(bn, max(1, N // 2))  # keep >=2 parallel steps for v7x megacore
    n_tiles = pl.cdiv(N, bn)

    vmem_need = (2 * bn * bytes_per_lane * tile_hw          # double-buffered x + out
                 + 2 * (Cout * Cin * x_itemsize + Cout * 4))  # resident W + shift
    vmem_limit = int(min(vmem_cap, max(vmem_need + (4 << 20), 32 << 20)))
    return bn, tile_hw, n_tiles, hw_tiles, vmem_limit


def basic_conv2d(x_nchw, weight, bn_gamma, bn_beta, bn_mean, bn_var,
                 eps=1e-5, compute_dtype=None):
    """x_nchw: [N, Cin, H, W]; weight: [Cout, Cin, 1, 1] (PyTorch layout).

    1x1 convolution + eval-mode BatchNorm + ReLU, fused, NCHW-native.
    compute_dtype: dtype for the x/W operand streams (e.g. jnp.bfloat16 to
    halve HBM read bytes); accumulation and epilogue are always f32 and the
    output keeps the input dtype.
    """
    N, Cin, H, W = x_nchw.shape
    Cout = weight.shape[0]
    HW = H * W
    out_dtype = x_nchw.dtype
    if compute_dtype is None:
        compute_dtype = x_nchw.dtype

    # Fold BN into the weight (scale) and a per-channel shift (f32).
    scale = (bn_gamma / jnp.sqrt(bn_var + eps)).astype(jnp.float32)        # (Cout,)
    shift = (bn_beta - bn_mean * scale).reshape(Cout, 1).astype(jnp.float32)
    w_mat = (weight.reshape(Cout, Cin).astype(jnp.float32)
             * scale[:, None]).astype(compute_dtype)                        # (Cout, Cin)

    # NCHW -> [N, Cin, HW]  (pure reshape, no transpose / no HBM shuffle)
    x_flat = x_nchw.reshape(N, Cin, HW).astype(compute_dtype)

    x_itemsize = jnp.dtype(compute_dtype).itemsize
    out_itemsize = jnp.dtype(out_dtype).itemsize
    bn_tile, tile_hw, n_tiles, hw_tiles, vmem_limit = _select_tiling(
        N, Cin, Cout, HW, x_itemsize, out_itemsize)

    cost = pl.CostEstimate(
        flops=int(2 * N * Cout * Cin * HW),
        bytes_accessed=int(N * HW * (Cin * x_itemsize + Cout * out_itemsize)
                           + Cout * Cin * x_itemsize + 2 * Cout * 4),
        transcendentals=0,
    )

    out_flat = pl.pallas_call(
        _make_conv_bn_relu_kernel(bn_tile),
        out_shape=jax.ShapeDtypeStruct((N, Cout, HW), out_dtype),
        grid_spec=pltpu.PrefetchScalarGridSpec(
            num_scalar_prefetch=0,
            grid=(n_tiles, hw_tiles),
            in_specs=[
                pl.BlockSpec((bn_tile, Cin, tile_hw), lambda n, j: (n, 0, j)),
                pl.BlockSpec((Cout, Cin), lambda n, j: (0, 0)),
                pl.BlockSpec((Cout, 1), lambda n, j: (0, 0)),
            ],
            out_specs=pl.BlockSpec((bn_tile, Cout, tile_hw),
                                   lambda n, j: (n, 0, j)),
        ),
        compiler_params=pltpu.CompilerParams(
            dimension_semantics=("parallel", "parallel"),
            vmem_limit_bytes=vmem_limit),
        cost_estimate=cost,
    )(x_flat, w_mat, shift)

    return out_flat.reshape(N, Cout, H, W)


def reference(x_nchw, weight, bn_gamma, bn_beta, bn_mean, bn_var, eps=1e-5):
    # Pure-JAX reference of the same forward semantics (1x1 conv, eval BN, relu).
    w = weight.reshape(weight.shape[0], weight.shape[1])  # [Cout, Cin]
    y = jnp.einsum('nchw,oc->nohw', x_nchw, w)
    scale = bn_gamma / jnp.sqrt(bn_var + eps)
    shift = bn_beta - bn_mean * scale
    y = y * scale[None, :, None, None] + shift[None, :, None, None]
    return jnp.maximum(y, 0.0)


if __name__ == "__main__":
    key = jax.random.PRNGKey(0)
    N, Cin, H, W = 2, 4, 16, 16
    Cout = 8

    k_x, k_w = jax.random.split(key)
    x = jax.random.normal(k_x, (N, Cin, H, W), dtype=jnp.float32)

    # Deterministic parameter init mirroring reset_parameters():
    #   conv: kaiming_normal_(mode='fan_out') -> std = sqrt(2 / (Cout*KH*KW))
    #   bn:   weight=1, bias=0 (and fresh running stats: mean=0, var=1)
    fan_out = Cout * 1 * 1
    std = (2.0 / fan_out) ** 0.5
    weight = std * jax.random.normal(k_w, (Cout, Cin, 1, 1), dtype=jnp.float32)
    bn_gamma = jnp.ones((Cout,), jnp.float32)
    bn_beta = jnp.zeros((Cout,), jnp.float32)
    bn_mean = jnp.zeros((Cout,), jnp.float32)
    bn_var = jnp.ones((Cout,), jnp.float32)

    ref = reference(x, weight, bn_gamma, bn_beta, bn_mean, bn_var)

    # Full-precision path (exact match to the PyTorch forward semantics).
    out = basic_conv2d(x, weight, bn_gamma, bn_beta, bn_mean, bn_var)
    out = jax.block_until_ready(out)
    assert out.shape == (N, Cout, H, W), out.shape
    assert jnp.allclose(out, ref, atol=1e-5, rtol=1e-5), "f32 mismatch vs reference"

    # Reduced-precision operand streams (halves HBM read bytes; f32 accum/epilogue).
    out_bf16 = basic_conv2d(x, weight, bn_gamma, bn_beta, bn_mean, bn_var,
                            compute_dtype=jnp.bfloat16)
    out_bf16 = jax.block_until_ready(out_bf16)
    assert jnp.allclose(out_bf16, ref, atol=5e-2, rtol=5e-2), "bf16 mismatch vs reference"

    print("KERNEL_OK")
</pallas_src>

<mosaic_0001>
module attributes {stable_mosaic.version = 11 : i64} {
  func.func @kernel(%arg0: i32, %arg1: i32, %arg2: memref<1x4x256xf32, #tpu.memory_space<vmem>>, %arg3: memref<8x4xf32, #tpu.memory_space<vmem>>, %arg4: memref<8x1xf32, #tpu.memory_space<vmem>>, %arg5: memref<1x8x256xf32, #tpu.memory_space<vmem>>) attributes {dimension_semantics = [#tpu.dimension_semantics<parallel>, #tpu.dimension_semantics<parallel>], iteration_bounds = array<i64: 2, 1>, scalar_prefetch = 0 : i64, scratch_operands = 0 : i64, tpu.core_type = #tpu.core_type<tc>, window_params = [{transform_indices = @transform_0, window_bounds = array<i64: 1, 4, 256>}, {pipeline_mode = #tpu.pipeline_mode<synchronous>, transform_indices = @transform_1, window_bounds = array<i64: 8, 4>}, {pipeline_mode = #tpu.pipeline_mode<synchronous>, transform_indices = @transform_2, window_bounds = array<i64: 8, 1>}, {transform_indices = @transform_3, window_bounds = array<i64: 1, 8, 256>}]} {
    %c0 = arith.constant 0 : index
    %c0_0 = arith.constant 0 : index
    %0 = vector.load %arg3[%c0, %c0_0] : memref<8x4xf32, #tpu.memory_space<vmem>>, vector<8x4xf32>
    %c0_1 = arith.constant 0 : index
    %c0_2 = arith.constant 0 : index
    %1 = vector.load %arg4[%c0_1, %c0_2] : memref<8x1xf32, #tpu.memory_space<vmem>>, vector<8x1xf32>
    %c0_3 = arith.constant 0 : index
    %c0_4 = arith.constant 0 : index
    %c0_5 = arith.constant 0 : index
    %2 = vector.load %arg2[%c0_3, %c0_4, %c0_5] : memref<1x4x256xf32, #tpu.memory_space<vmem>>, vector<1x4x256xf32>
    %3 = vector.shape_cast %2 : vector<1x4x256xf32> to vector<4x256xf32>
    %cst = arith.constant dense<0.000000e+00> : vector<8x256xf32>
    %4 = tpu.matmul %0, %3, %cst {dimension_numbers = #tpu.dot_dimension_numbers<[1], [0], [0], [1], [0, 0, 1, 1], [], []>} : vector<8x4xf32>, vector<4x256xf32>, vector<8x256xf32> -> vector<8x256xf32>
    %5 = vector.broadcast %1 : vector<8x1xf32> to vector<8x256xf32>
    %6 = arith.addf %4, %5 : vector<8x256xf32>
    %cst_6 = arith.constant 0.000000e+00 : f32
    %7 = vector.broadcast %cst_6 : f32 to vector<8x256xf32>
    %8 = arith.maximumf %6, %7 : vector<8x256xf32>
    %c0_7 = arith.constant 0 : index
    %c0_8 = arith.constant 0 : index
    %c0_9 = arith.constant 0 : index
    %9 = vector.load %arg5[%c0_7, %c0_8, %c0_9] : memref<1x8x256xf32, #tpu.memory_space<vmem>>, vector<1x8x256xf32>
    %10 = vector.shape_cast %9 : vector<1x8x256xf32> to vector<8x256xf32>
    %11 = vector.shape_cast %8 : vector<8x256xf32> to vector<1x8x256xf32>
    tpu.vector_store %arg5[%c0_7, %c0_8, %c0_9], %11 {strides = array<i32>} : memref<1x8x256xf32, #tpu.memory_space<vmem>>, vector<1x8x256xf32>,
    return
  }
  func.func @transform_0(%arg0: i32, %arg1: i32) -> (i32, i32, i32) {
    %c0_i32 = arith.constant 0 : i32
    %c0_i32_0 = arith.constant 0 : i32
    return %arg0, %c0_i32, %arg1 : i32, i32, i32
  }
  func.func @transform_1(%arg0: i32, %arg1: i32) -> (i32, i32) {
    %c0_i32 = arith.constant 0 : i32
    %c0_i32_0 = arith.constant 0 : i32
    %c0_i32_1 = arith.constant 0 : i32
    return %c0_i32, %c0_i32_0 : i32, i32
  }
  func.func @transform_2(%arg0: i32, %arg1: i32) -> (i32, i32) {
    %c0_i32 = arith.constant 0 : i32
    %c0_i32_0 = arith.constant 0 : i32
    %c0_i32_1 = arith.constant 0 : i32
    return %c0_i32, %c0_i32_0 : i32, i32
  }
  func.func @transform_3(%arg0: i32, %arg1: i32) -> (i32, i32, i32) {
    %c0_i32 = arith.constant 0 : i32
    %c0_i32_0 = arith.constant 0 : i32
    return %arg0, %c0_i32, %arg1 : i32, i32, i32
  }
}

</mosaic_0001>

<bundles_post_ra>
// kernel: tpu_custom_call.1
= control target key start
LH: loop header
LB: loop body
LE: loop exit
PB: predicated region body
PF: predicated region fallthrough
CT: control target
= control target key end

     0   :  { %8 = vsyncpa [#allocation3], 0  ;;  %s685_s0 = inlined_call_operand.vmem [shape: f32[2,4,256], index: 0, kind: input, shape index: {}]   ;;  %s686_s1 = inlined_call_operand.vmem [shape: f32[8,4], index: 1, kind: input, shape index: {}]   ;;  %s687_s2 = inlined_call_operand.vmem [shape: f32[8,1], index: 2, kind: input, shape index: {}]   ;;  %s688_s3 = inlined_call_operand.hbm [shape: f32[2,8,256], index: 3, kind: output, shape index: {}]  }
   0x1   :  { %10 = vsyncpa [#allocation3 + $0x1], 0  ;;  %s567_s12 = smov 0   ;;  %s569_s13 = smov 0  }
   0x2   :  { %s571_s14 = smov 0   ;;  %s573_s15 = smov 0  }
   0x3   :  { %s575_s16 = smov 0   ;;  %s577_s17 = smov 0  }
   0x4 LB: > { %s387_s18 = sadd.s32 4294967295, %s542_s17   ;;  %s388_s19 = sadd.s32 4294967294, %s542_s17   ;;  %s542_s17 = sphi %s577_s17, %s16_s17   ;;  %s538_s16 = sphi %s575_s16, %s695_s16   ;;  %s534_s15 = sphi %s573_s15, %s694_s15   ;;  %s530_s14 = sphi %s571_s14, %s693_s14   ;;  %s526_s13 = sphi %s569_s13, %s692_s13   ;;  %s522_s12 = sphi %s567_s12, %s691_s12  }
   0x5   : > { %s28_s20 = sadd.s32 1, %s538_s16  ;;  %s107_s21 = sadd.s32 1, %s530_s14 }
   0x6   : > { %p30_p0 = scmp.ge.s32.totalorder %s28_s20, 2  ;;  %p117_p1 = scmp.ne.s32.totalorder %s530_s14, %s526_s13 }
   0x7   : > { %p118_p2 = scmp.eq.s32.totalorder %s387_s18, 1  ;;  %p123_p3 = scmp.ne.s32.totalorder %s526_s13, %s522_s12 }
   0x8   : > { %s697_s20 = smov (%p30_p0, %s28_s20), 0  ;;  %p124_p5 = scmp.eq.s32.totalorder %s388_s19, 1 }
   0x9   : > { %p607_p4 = por %p118_p2, %p117_p1  ;;  %s102_s23 = ssub.s32 %s538_s16, %s697_s20 }
   0xa   : > { %p391_p6 = scmp.ge.s32.totalorder %s542_s17, 1  ;;  %p105_p7 = scmp.eq.s32.totalorder %s102_s23, 0 }
   0xb   : > { %p614_p8 = por %p124_p5, %p123_p3  ;;  %p161_p9 = scmp.lt.s32.totalorder %s542_s17, 3 }
   0xc   : > { %s620_s25 = scalar_select %p105_p7, %s530_s14, %s107_s21  }
   0xd   : > { %p162_p10 = pnand %p391_p6, %p161_p9 }
   0xe   : > { %p190_p11 = scmp.lt.s32.totalorder (!%p162_p10), %s534_s15, 1  ;;  %v544_v0 = vmov (!%p162_p10), 0.0   ;;  %v545_v1 = vmov (!%p162_p10), 0   ;;  %v201_v2 = vld [vmem:[%s687_s2] sm:$0xff] (!%p162_p10)  ;;  %vm214_vm0 = vcmask (!%p162_p10), 1043456   ;;  %vm210_vm1 = vcmask (!%p162_p10), 31744  }
   0xf   : > { %165 = sbr.rel (%p162_p10) target bundleno = 262 (0x106), region = 32  ;;  %283 = vmatprep.mubr.f32.mxu0 (!%p162_p10), %v544_v0  ;;  %462 = vset.pattern.permute.xlu0 (!%p162_p10), %v545_v1  ;;  %v200_v5 = vld [vmem:[%s686_s1] sm:$0xff] (!%p162_p10)  ;;  %s186_s8 = sand.u32 (!%p162_p10), 1, %s526_s13  }
  0x10   : > { %205 = vperm.xlu0 (!%p162_p10), %462, %v201_v2   ;;  %s392_s9 = sshll.u32 (!%p162_p10), %s186_s8, 4  ;;  %s404_s10 = sshll.u32 (!%p162_p10), %s534_s15, 8 }
  0x11   : > { %s188_s11 = scalar_lea.vmem (!%p162_p10), [#allocation2], %s392_s9  ;;  %s638_s23 = scalar_lea.hbm (!%p162_p10), %s688_s3, %s404_s10 }
  0x12   : > { %s311_s18 = sshll.u32 (!%p162_p10), %s188_s11, 4  ;;  %s295_s26 = scalar_lea.sflag (!%p162_p10), [#allocation3], %s186_s8  ;;  %s640_s18 = int_to_ptr.vmem [resolvable:$true] %s311_s18 }
  0x13   : > { %s464_s27 = scalar_lea.vmem (!%p162_p10), %s640_s18, 256 }
  0x14   : > { %p465_p12 = scmp.ne.s32.totalorder (!%p162_p10), %s640_s18, %s464_s27 }
  0x16   : > { %s191_s28 = scalar_select %p190_p11, %s534_s15, 1 }
  0x17   : > { %p466_p13 = pnand %p465_p12, %p607_p4  ;;  %s546_s15 = smov [#allocation2]  }
  0x18   : > { %s403_s29 = sshll.u32 %s191_s28, 3  ;;  %s468_s28 = sshll.u32 %s546_s15, 4  ;;  %s469_s28 = int_to_ptr.vmem [resolvable:$false] %s468_s28 }
  0x19   : > { %s197_s5 = scalar_lea.vmem %s685_s0, %s403_s29  ;;  %p467_p0 = pneg %p466_p13 }
  0x1a   : > { %v202_v3 = vld [vmem:[%s197_s5] sm:$0xff]  ;;  %s470_s29 = scalar_lea.vmem %s469_s28, 512  ;;  %p471_p1 = scmp.lt.s32.totalorder %s640_s18, %s469_s28 }
  0x1b   : > { %v209_v4 = vcombine.high %v202_v3, %v202_v3  ;;  %p472_p2 = scmp.lt.s32.totalorder %s470_s29, %s464_s27 }
  0x1d   : > { %395 = vmatprep.subr.msk.mxu0 %vm214_vm0, %v209_v4  ;;  %p473_p3 = por %p472_p2, %p471_p1 }
  0x1e   : > { %396 = vmatpush1.msk.msra.mxu0 %vm214_vm0, %v202_v3 }
  0x1f   : > { %397 = vmatmul.mubr.msk.f32.vlgmr.msra.gmra.mrb[0].mxu0 %vm210_vm1, %v200_v5  ;;  %p474_p5 = pnand %p473_p3, %p467_p0 }
  0x8f   : > { %v206_v6 = vpop.permute.xlu0 %205 }
  0xf2   : > { %v285_v7 = vpop.f32.mrb[0].mxu0 }
  0xf3   : > { %v286_v8 = vadd.f32 %v285_v7, %v206_v6  ;;  %v287_v9 = vpop.f32.mrb[1].mxu0 }
  0xf4   : > { %v288_v10 = vadd.f32 %v287_v9, %v206_v6 }
  0xf5   : > { %v290_v11 = vmax.f32 %v286_v8, 0.0 }
  0xf6   : > { %v291_v12 = vmax.f32 %v288_v10, 0.0 }
  0xf7   : > { %292 = vst [vmem:[%s188_s11] sm:$0xff] %v290_v11 }
  0xf8   : > { %293 = vst [vmem:[%s188_s11 + $0x8] sm:$0xff] %v291_v12 }
  0xf9   : > { %477 = shalt.err (!%p474_p5)
}
  0xfa   : > { %s478_s30 = scalar_lea.hbm %s638_s23, 256  ;;  %s482_s6 = scalar_lea.hbm %s688_s3, 512 }
  0xfb   : > { %p479_p6 = scmp.ne.s32.totalorder %s638_s23, %s478_s30  ;;  %p483_p10 = scmp.lt.u32.totalorder %s638_s23, %s688_s3 }
  0xfc   : > { %p484_p11 = scmp.lt.u32.totalorder %s482_s6, %s478_s30  ;;  %p486_p13 = scmp.lt.u32.totalorder %s478_s30, %s638_s23 }
  0xfd   : > { %p480_p7 = pnand %p479_p6, %p607_p4 }
  0xfe   : > { %p485_p12 = por %p484_p11, %p483_p10 }
  0xff   : > { %p481_p9 = pneg %p480_p7 }
 0x100   : > { %p487_p0 = por %p486_p13, %p485_p12 }
 0x102   : > { %p488_p1 = pnand %p487_p0, %p481_p9 }
 0x104   : > { %491 = shalt.err (!%p488_p1)
}
 0x105   : > { %405 = dma.vmem_to_hbm [thread:$0]  (%p607_p4), %s640_s18, 256, %s638_s23, %s295_s26  }
 0x106 PF: > { %p411_p2 = scmp.ge.s32.totalorder %s542_s17, 2  ;;  %s323_s9 = sand.u32 1, %s522_s12  }
 0x107   : > { %s324_s10 = scalar_lea.sflag [#allocation3], %s323_s9 }
 0x108   : > { %p408_p3 = pnand %p411_p2, %p614_p8 }
 0x10a   : > { %517 = dma.done.wait (!%p408_p3), %s324_s10, 256  }
 0x10b   : > { %519 = vsyncadd (!%p408_p3), %s324_s10, 4294967040  ;;  %s16_s17 = sadd.s32 1, %s542_s17   ;;  %s691_s12 = smov %s526_s13 }
 0x10c   : > { %p13_p5 = scmp.ge.s32.totalorder %s16_s17, 4   ;;  %s692_s13 = smov %s530_s14 }
 0x10d   : > { %s693_s14 = smov %s620_s25  ;;  %s694_s15 = smov %s538_s16 }
 0x10e   : > { %s695_s16 = smov %s697_s20  ;;  %15 = sbr.rel (!%p13_p5) target bundleno = 4 (0x4), region = 67 }
 0x115   :  { %329 = vsyncpa [#allocation3], 1 }
 0x116   :  { %331 = vsyncpa [#allocation3 + $0x1], 1 }

</bundles_post_ra>
